<compile_context>
chip_gen: v6e
topology: v6e:2x2x1
jax: 0.10.0
libtpu: 0.0.40
codegen_flags: <defaults>
</compile_context>

<pallas_src>
import jax
import jax.numpy as jnp
from jax.experimental import pallas as pl
from jax.experimental.pallas import tpu as pltpu


# ----------------------------------------------------------------------------
# Primary path: folded head  (logits = x_cat @ (W2 @ W1).T)
# ----------------------------------------------------------------------------
def _folded_head_kernel(x_sig_ref, x_seq_ref, w_sig_ref, w_seq_ref, out_ref):
    """Single-step kernel: logits = x_sig @ We_sig + x_seq @ We_seq."""
    acc = jnp.dot(x_sig_ref[...], w_sig_ref[...],
                  preferred_element_type=jnp.float32)
    acc = acc + jnp.dot(x_seq_ref[...], w_seq_ref[...],
                        preferred_element_type=jnp.float32)
    out_ref[...] = acc.astype(out_ref.dtype)


def fold_classifier_weights(w1, w2, f_sig):
    """ONE-TIME (model-load) weight fold — not part of the hot path.

    w1: [H, D_in] torch layout, w2: [C, H] torch layout.  Fold in f32 (avoids
    compounding bf16 rounding), transpose to [D_in, C] (canonical contraction
    in-kernel), split at the concat boundary, cast to bf16.
    """
    w_eff_t = (w2.astype(jnp.float32) @ w1.astype(jnp.float32)).T  # [D_in, C]
    return (w_eff_t[:f_sig].astype(jnp.bfloat16),   # [F_sig, C]
            w_eff_t[f_sig:].astype(jnp.bfloat16))   # [F_seq, C]


def classifier_head_folded(x_sig_feat, x_seq_feat, w_eff_sig, w_eff_seq):
    """ClassifierHead.forward from the concat point onward (eval semantics)."""
    b, f_sig = x_sig_feat.shape
    _, f_seq = x_seq_feat.shape
    c = w_eff_sig.shape[1]
    d_in = f_sig + f_seq

    return pl.pallas_call(
        _folded_head_kernel,
        out_shape=jax.ShapeDtypeStruct((b, c), jnp.float32),
        grid_spec=pltpu.PrefetchScalarGridSpec(
            num_scalar_prefetch=0,
            grid=(1,),
            in_specs=[
                pl.BlockSpec((b, f_sig), lambda i: (0, 0)),
                pl.BlockSpec((b, f_seq), lambda i: (0, 0)),
                pl.BlockSpec((f_sig, c), lambda i: (0, 0)),
                pl.BlockSpec((f_seq, c), lambda i: (0, 0)),
            ],
            out_specs=pl.BlockSpec((b, c), lambda i: (0, 0)),
        ),
        compiler_params=pltpu.CompilerParams(
            dimension_semantics=("arbitrary",)),
        cost_estimate=pl.CostEstimate(
            flops=2 * b * d_in * c,
            transcendentals=0,
            bytes_accessed=2 * b * d_in + 2 * d_in * c + 4 * b * c),
    )(x_sig_feat.astype(jnp.bfloat16), x_seq_feat.astype(jnp.bfloat16),
      w_eff_sig, w_eff_seq)


# ----------------------------------------------------------------------------
# Secondary path: improved H-tiled streaming kernel (no weight fold)
# ----------------------------------------------------------------------------
def _streaming_head_kernel(x_ref, w1t_ref, w2t_ref, out_ref):
    """One H-tile: h_j = x_cat @ W1T[:, j] ; out += h_j @ W2T[j, :]."""
    j = pl.program_id(1)

    @pl.when(j == 0)
    def _():
        out_ref[...] = jnp.zeros_like(out_ref)

    # Canonical ((1,),(0,)) contractions — weights were pre-transposed offline,
    # so no runtime transpose / XLU traffic is emitted.
    h = jnp.dot(x_ref[...], w1t_ref[...], preferred_element_type=jnp.float32)
    out_ref[0] += jnp.dot(h.astype(jnp.bfloat16), w2t_ref[...],
                          preferred_element_type=jnp.float32)


def prepare_streaming_weights(w1, w2, *, tn=512, num_splits=1):
    """ONE-TIME (model-load) weight prep for the streaming path.

    Transposes to canonical-contraction layout and zero-pads H so the grid is
    exact.  To keep pad waste minimal at production sizes, pick tn so that
    ceil(H/128)*128 is divisible by tn*num_splits (e.g. H=4756 -> H_pad=4864,
    2.3% waste with tn=2432/num_splits=1 on v5e/v6e, or tn=1216/num_splits=2
    on v7x), per the review.
    """
    h, _ = w1.shape
    mult = tn * num_splits
    h_pad = ((h + mult - 1) // mult) * mult
    pad = h_pad - h
    w1t = jnp.pad(w1, ((0, pad), (0, 0))).T.astype(jnp.bfloat16)   # [D_in, H_pad]
    w2t = jnp.pad(w2, ((0, 0), (0, pad))).T.astype(jnp.bfloat16)   # [H_pad, C]
    return w1t, w2t


def classifier_head_streaming(x_sig_feat, x_seq_feat, w1t, w2t, *,
                              tn=512, num_splits=1,
                              vmem_limit_bytes=48 << 20):
    """Streaming (non-folded) head.

    num_splits: 1 on single-TC v5e/v6e; 2 on v7x (leading 'parallel' axis
    shards the weight stream across both TensorCores).
    tn: H tile size (multiple of 128).  512 is safe everywhere; ~1280 on v7x
    (keep vmem_limit_bytes <= 48 MB), up to ~2432-2560 on v6e's 128 MiB VMEM
    (raise vmem_limit_bytes accordingly).
    """
    b = x_sig_feat.shape[0]
    d_in, h_pad = w1t.shape
    c = w2t.shape[1]
    assert h_pad % (tn * num_splits) == 0
    steps = h_pad // (tn * num_splits)

    # x_cat built once, bf16 (~0.15% of the weight bytes): one merged weight
    # DMA per step instead of two split sig/seq streams.
    x_cat = jnp.concatenate([x_sig_feat, x_seq_feat], axis=1).astype(jnp.bfloat16)

    partials = pl.pallas_call(
        _streaming_head_kernel,
        out_shape=jax.ShapeDtypeStruct((num_splits, b, c), jnp.float32),
        grid_spec=pltpu.PrefetchScalarGridSpec(
            num_scalar_prefetch=0,
            grid=(num_splits, steps),
            in_specs=[
                pl.BlockSpec((b, d_in), lambda s, j: (0, 0)),
                pl.BlockSpec((d_in, tn), lambda s, j: (0, s * steps + j)),
                pl.BlockSpec((tn, c), lambda s, j: (s * steps + j, 0)),
            ],
            out_specs=pl.BlockSpec((1, b, c), lambda s, j: (s, 0, 0)),
        ),
        compiler_params=pltpu.CompilerParams(
            # leading axis "parallel": megacore split of the weight stream on
            # v7x; H-tile axis "arbitrary": it carries the output accumulator.
            dimension_semantics=("parallel", "arbitrary"),
            vmem_limit_bytes=vmem_limit_bytes),
        cost_estimate=pl.CostEstimate(
            flops=2 * b * d_in * h_pad + 2 * b * h_pad * c,
            transcendentals=0,
            bytes_accessed=(2 * d_in * h_pad + 2 * h_pad * c
                            + 2 * b * d_in + 4 * num_splits * b * c)),
    )(x_cat, w1t, w2t)

    # Tiny [num_splits, B, C] cross-core reduction (no-op cost at num_splits=1).
    return partials.sum(axis=0)


# ----------------------------------------------------------------------------
# Demo / self-check
# ----------------------------------------------------------------------------
if __name__ == "__main__":
    # Small shapes consistent with the module (scaled down from
    # linear_dimensions=(4756, 4756), num_classes=6).
    B = 8              # batch
    F_SIG = 128        # flattened signal-feature width
    F_SEQ = 64         # flattened sequence-feature width (d_model*max_len-like)
    D_IN = F_SIG + F_SEQ   # concat width == linear_dimensions[0]
    H = D_IN               # linear_dimensions[1] (square in the module)
    C = 6              # num_classes
    TN = 128           # demo-scale H tile; see docstring for production sizes
    NUM_SPLITS = 2     # exercise the v7x dual-TensorCore split in the demo

    key = jax.random.PRNGKey(0)
    k_sig, k_seq, k_w1, k_w2 = jax.random.split(key, 4)

    x_sig_feat = jax.random.normal(k_sig, (B, F_SIG), dtype=jnp.float32)
    x_seq_feat = jax.random.normal(k_seq, (B, F_SEQ), dtype=jnp.float32)
    # torch nn.Linear weight layout: [out_features, in_features]; bias=False
    # in the module, so there are no bias terms to add.
    w1 = jax.random.normal(k_w1, (H, D_IN), dtype=jnp.float32) * 0.02
    w2 = jax.random.normal(k_w2, (C, H), dtype=jnp.float32) * 0.02

    bf = lambda a: a.astype(jnp.bfloat16).astype(jnp.float32)
    x_cat_f32 = jnp.concatenate([x_sig_feat, x_seq_feat], axis=1)

    # ---- Primary: folded path ----
    w_eff_sig, w_eff_seq = fold_classifier_weights(w1, w2, F_SIG)
    logits = jax.block_until_ready(
        classifier_head_folded(x_sig_feat, x_seq_feat, w_eff_sig, w_eff_seq))

    # Reference with the kernel's exact rounding points (bf16 x / bf16 W_eff,
    # f32 accumulation).
    w_eff_t_bf = jnp.concatenate([bf(w_eff_sig), bf(w_eff_seq)], axis=0)
    ref_folded = bf(x_cat_f32) @ w_eff_t_bf
    assert logits.shape == (B, C)
    assert jnp.allclose(logits, ref_folded, atol=2e-3, rtol=2e-3)

    # And against the pure-f32 torch-semantics reference (looser: bf16 casts).
    ref_f32 = (x_cat_f32 @ w1.T) @ w2.T
    assert jnp.allclose(logits, ref_f32, atol=5e-2, rtol=5e-2)

    # ---- Secondary: improved streaming path ----
    w1t, w2t = prepare_streaming_weights(w1, w2, tn=TN, num_splits=NUM_SPLITS)
    logits_s = jax.block_until_ready(
        classifier_head_streaming(x_sig_feat, x_seq_feat, w1t, w2t,
                                  tn=TN, num_splits=NUM_SPLITS))

    # Reference mirroring the streaming kernel's rounding points
    # (bf16 x / W1 / W2, f32 accumulation, h rounded to bf16 before matmul 2).
    h_ref = bf(x_cat_f32) @ bf(w1).T
    ref_stream = bf(h_ref) @ bf(w2).T
    assert logits_s.shape == (B, C)
    assert jnp.allclose(logits_s, ref_stream, atol=2e-3, rtol=2e-3)

    print("KERNEL_OK")
</pallas_src>

<mosaic_0001>
module attributes {stable_mosaic.version = 11 : i64} {
  func.func @_folded_head_kernel(%arg0: i32, %arg1: memref<8x128xbf16, #tpu.memory_space<vmem>>, %arg2: memref<8x64xbf16, #tpu.memory_space<vmem>>, %arg3: memref<128x6xbf16, #tpu.memory_space<vmem>>, %arg4: memref<64x6xbf16, #tpu.memory_space<vmem>>, %arg5: memref<8x6xf32, #tpu.memory_space<vmem>>) attributes {dimension_semantics = [#tpu.dimension_semantics<arbitrary>], iteration_bounds = array<i64: 1>, scalar_prefetch = 0 : i64, scratch_operands = 0 : i64, tpu.core_type = #tpu.core_type<tc>, window_params = [{pipeline_mode = #tpu.pipeline_mode<synchronous>, transform_indices = @transform_0, window_bounds = array<i64: 8, 128>}, {pipeline_mode = #tpu.pipeline_mode<synchronous>, transform_indices = @transform_1, window_bounds = array<i64: 8, 64>}, {pipeline_mode = #tpu.pipeline_mode<synchronous>, transform_indices = @transform_2, window_bounds = array<i64: 128, 6>}, {pipeline_mode = #tpu.pipeline_mode<synchronous>, transform_indices = @transform_3, window_bounds = array<i64: 64, 6>}, {pipeline_mode = #tpu.pipeline_mode<synchronous>, transform_indices = @transform_4, window_bounds = array<i64: 8, 6>}]} {
    %c0 = arith.constant 0 : index
    %c0_0 = arith.constant 0 : index
    %0 = vector.load %arg1[%c0, %c0_0] : memref<8x128xbf16, #tpu.memory_space<vmem>>, vector<8x128xbf16>
    %c0_1 = arith.constant 0 : index
    %c0_2 = arith.constant 0 : index
    %1 = vector.load %arg3[%c0_1, %c0_2] : memref<128x6xbf16, #tpu.memory_space<vmem>>, vector<128x6xbf16>
    %cst = arith.constant dense<0.000000e+00> : vector<8x6xf32>
    %2 = tpu.matmul %0, %1, %cst {dimension_numbers = #tpu.dot_dimension_numbers<[1], [0], [0], [1], [0, 0, 1, 1], [], []>} : vector<8x128xbf16>, vector<128x6xbf16>, vector<8x6xf32> -> vector<8x6xf32>
    %c0_3 = arith.constant 0 : index
    %c0_4 = arith.constant 0 : index
    %3 = vector.load %arg2[%c0_3, %c0_4] : memref<8x64xbf16, #tpu.memory_space<vmem>>, vector<8x64xbf16>
    %c0_5 = arith.constant 0 : index
    %c0_6 = arith.constant 0 : index
    %4 = vector.load %arg4[%c0_5, %c0_6] : memref<64x6xbf16, #tpu.memory_space<vmem>>, vector<64x6xbf16>
    %cst_7 = arith.constant dense<0.000000e+00> : vector<8x6xf32>
    %5 = tpu.matmul %3, %4, %cst_7 {dimension_numbers = #tpu.dot_dimension_numbers<[1], [0], [0], [1], [0, 0, 1, 1], [], []>} : vector<8x64xbf16>, vector<64x6xbf16>, vector<8x6xf32> -> vector<8x6xf32>
    %6 = arith.addf %2, %5 : vector<8x6xf32>
    %c0_8 = arith.constant 0 : index
    %c0_9 = arith.constant 0 : index
    %7 = vector.load %arg5[%c0_8, %c0_9] : memref<8x6xf32, #tpu.memory_space<vmem>>, vector<8x6xf32>
    tpu.vector_store %arg5[%c0_8, %c0_9], %6 {strides = array<i32>} : memref<8x6xf32, #tpu.memory_space<vmem>>, vector<8x6xf32>,
    return
  }
  func.func @transform_0(%arg0: i32) -> (i32, i32) {
    %c0_i32 = arith.constant 0 : i32
    %c0_i32_0 = arith.constant 0 : i32
    %c0_i32_1 = arith.constant 0 : i32
    return %c0_i32, %c0_i32_0 : i32, i32
  }
  func.func @transform_1(%arg0: i32) -> (i32, i32) {
    %c0_i32 = arith.constant 0 : i32
    %c0_i32_0 = arith.constant 0 : i32
    %c0_i32_1 = arith.constant 0 : i32
    return %c0_i32, %c0_i32_0 : i32, i32
  }
  func.func @transform_2(%arg0: i32) -> (i32, i32) {
    %c0_i32 = arith.constant 0 : i32
    %c0_i32_0 = arith.constant 0 : i32
    %c0_i32_1 = arith.constant 0 : i32
    return %c0_i32, %c0_i32_0 : i32, i32
  }
  func.func @transform_3(%arg0: i32) -> (i32, i32) {
    %c0_i32 = arith.constant 0 : i32
    %c0_i32_0 = arith.constant 0 : i32
    %c0_i32_1 = arith.constant 0 : i32
    return %c0_i32, %c0_i32_0 : i32, i32
  }
  func.func @transform_4(%arg0: i32) -> (i32, i32) {
    %c0_i32 = arith.constant 0 : i32
    %c0_i32_0 = arith.constant 0 : i32
    %c0_i32_1 = arith.constant 0 : i32
    return %c0_i32, %c0_i32_0 : i32, i32
  }
}

</mosaic_0001>

<bundles_post_ra>
// kernel: tpu_custom_call.1
= control target key start
LH: loop header
LB: loop body
LE: loop exit
PB: predicated region body
PF: predicated region fallthrough
CT: control target
= control target key end

     0   :  { %v313_v1 = vmov 0.0   ;;  %vm314_vm0 = vmmov 0   ;;  %s386_s0 = inlined_call_operand.vmem [shape: bf16[8,128], index: 0, kind: input, shape index: {}]   ;;  %s387_s1 = inlined_call_operand.vmem [shape: bf16[8,64], index: 1, kind: input, shape index: {}]   ;;  %s388_s2 = inlined_call_operand.vmem [shape: bf16[128,6], index: 2, kind: input, shape index: {}]   ;;  %s389_s3 = inlined_call_operand.vmem [shape: bf16[64,6], index: 3, kind: input, shape index: {}]   ;;  %s390_s4 = inlined_call_operand.hbm [shape: f32[8,6], index: 4, kind: output, shape index: {}]  }
   0x1   :  { %v279_v0 = vld [vmem:[%s388_s2 + $0x38] sm:$0xff]   ;;  %256 = vmatprep.subr.bf16.mxu1 %v313_v1  ;;  %244 = vmatprep.subr.bf16.mxu0 %v313_v1  ;;  %v280_v2 = vld [vmem:[%s388_s2 + $0x30] sm:$0xff]   ;;  %v281_v5 = vld [vmem:[%s388_s2 + $0x28] sm:$0xff]  }
   0x2   :  { %257 = vmatpush3.bf16.msra.mxu1 %v279_v0  ;;  %252 = vmatprep.mubr.msk.bf16.mxu0 %vm314_vm0, %v313_v1  ;;  %v282_v3 = vld [vmem:[%s389_s3 + $0x18] sm:$0xff]   ;;  %v284_v4 = vld [vmem:[%s389_s3 + $0x10] sm:$0xff]   ;;  %v286_v6 = vld [vmem:[%s389_s3 + $0x8] sm:$0xff]  }
   0x3   :  { %258 = vmatprep.subr.bf16.mxu1 %v313_v1  ;;  %272 = vmatprep.mubr.msk.bf16.mxu1 %vm314_vm0, %v313_v1  ;;  %v283_v7 = vld [vmem:[%s388_s2 + $0x20] sm:$0xff]  }
   0x4   :  { %245 = vmatpush3.bf16.msra.mxu0 %v282_v3 }
   0x5   :  { %246 = vmatprep.subr.bf16.mxu0 %v313_v1 }
   0x6   :  { %259 = vmatpush3.bf16.msra.mxu1 %v280_v2 }
   0x7   :  { %260 = vmatprep.subr.bf16.mxu1 %v313_v1 }
   0x8   :  { %247 = vmatpush3.bf16.msra.mxu0 %v284_v4 }
   0x9   :  { %248 = vmatprep.subr.bf16.mxu0 %v313_v1 }
   0xa   :  { %261 = vmatpush3.bf16.msra.mxu1 %v281_v5 }
   0xb   :  { %262 = vmatprep.subr.bf16.mxu1 %v313_v1 }
   0xc   :  { %9 = vsyncpa [#allocation3], 0  ;;  %249 = vmatpush3.bf16.msra.mxu0 %v286_v6  ;;  %v288_v8 = vld [vmem:[%s389_s3] sm:$0xff]   ;;  %v285_v9 = vld [vmem:[%s388_s2 + $0x18] sm:$0xff]   ;;  %vm69_vm1 = vcmask 523264   ;;  %s315_s15 = smov [#allocation2]  }
   0xd   :  { %250 = vmatprep.subr.bf16.mxu0 %v313_v1  ;;  %v36_v10 = vld [vmem:[%s387_s1] sm:$0xf]  ;;  %v287_v11 = vld [vmem:[%s388_s2 + $0x10] sm:$0xff]   ;;  %v289_v12 = vld [vmem:[%s388_s2 + $0x8] sm:$0xff]   ;;  %s209_s16 = sshll.u32 %s315_s15, 4  ;;  %vm201_vm2 = vcmask 48128   ;;  %s210_s16 = int_to_ptr.vmem [resolvable:$true] %s209_s16 }
   0xe   :  { %263 = vmatpush3.bf16.msra.mxu1 %v283_v7  ;;  %v290_v13 = vld [vmem:[%s388_s2] sm:$0xff]   ;;  %s291_s2 = scalar_lea.vmem %s210_s16, 128  ;;  %p296_p1 = scmp.lt.s32.totalorder %s210_s16, %s210_s16 }
   0xf   :  { %264 = vmatprep.subr.bf16.mxu1 %v313_v1  ;;  %v19_v14 = vld [vmem:[%s386_s0] sm:$0xf]  ;;  %p292_p0 = scmp.ne.s32.totalorder %s210_s16, %s291_s2  ;;  %p297_p2 = scmp.lt.s32.totalorder %s291_s2, %s291_s2 }
  0x10   :  { %251 = vmatpush3.bf16.msra.mxu0 %v288_v8 }
  0x11   :  { %p298_p3 = por %p297_p2, %p296_p1 }
  0x12   :  { %265 = vmatpush3.bf16.msra.mxu1 %v285_v9 }
  0x13   :  { %266 = vmatprep.subr.bf16.mxu1 %v313_v1  ;;  %253 = vmatmul.mubr.msk.bf16.vlgmr.msra.gmra.mxu0 %vm69_vm1, %v36_v10  ;;  %p299_p4 = pnand %p298_p3, %p292_p0 }
  0x16   :  { %267 = vmatpush3.bf16.msra.mxu1 %v287_v11 }
  0x17   :  { %268 = vmatprep.subr.bf16.mxu1 %v313_v1 }
  0x1a   :  { %269 = vmatpush3.bf16.msra.mxu1 %v289_v12 }
  0x1b   :  { %270 = vmatprep.subr.bf16.mxu1 %v313_v1 }
  0x1e   :  { %271 = vmatpush3.bf16.msra.mxu1 %v290_v13 }
  0x21   :  { %273 = vmatmul.mubr.bf16.vlgmr.msra.gmra.mxu1 %v19_v14 }
  0xd3   :  { %v107_v15 = vpop.f32.mrf.mxu0 }
  0xd5   :  { %v254_v16 = vpop.f32.mrf.mxu0 }
  0xd7   :  { %v110_v17 = vpop.f32.mrf.mxu0 }
  0xd9   :  { %v255_v18 = vpop.f32.mrf.mxu0 }
  0xe1   :  { %v195_v19 = vpop.f32.mrf.mxu1 }
  0xe2   :  { %v196_v20 = vadd.f32 %v195_v19, %v107_v15 }
  0xe3   :  { %v274_v21 = vpop.f32.mrf.mxu1 }
  0xe4   :  { %202 = vst.msk [vmem:[#allocation2] sm:$0xff] %vm201_vm2, %v196_v20 }
  0xe5   :  { %v198_v22 = vpop.f32.mrf.mxu1 }
  0xe6   :  { %302 = shalt.err (!%p299_p4)
}
  0xe7   :  { %212 = dma.vmem_to_hbm [thread:$0]  %s210_s16, 128, %s390_s4, [#allocation3]   ;;  %v275_v23 = vpop.f32.mrf.mxu1 }
  0xe8   :  { %311 = dma.done.wait [#allocation3], 128  }
  0xe9   :  { %312 = vsyncadd [#allocation3], 4294967168 }
  0xea   :  { %216 = vsyncpa [#allocation3], 1 }

</bundles_post_ra>
